<compile_context>
chip_gen: v7x
topology: tpu7x:2x2x1
jax: 0.10.0
libtpu: 0.0.40
codegen_flags: <defaults>
</compile_context>

<pallas_src>
import jax
import jax.numpy as jnp
from jax.experimental import pallas as pl
from jax.experimental.pallas import tpu as pltpu


def _round_up(x: int, m: int) -> int:
    return (x + m - 1) // m * m


_SQRT_HALF = 0.7071067811865476


def _erf(z):
    # Abramowitz & Stegun 7.1.26 polynomial, |abs err| <= 1.5e-7 (f32 input).
    a1, a2, a3, a4, a5 = (0.254829592, -0.284496736, 1.421413741,
                          -1.453152027, 1.061405429)
    p = 0.3275911
    az = jnp.abs(z)
    t = 1.0 / (1.0 + p * az)
    poly = t * (a1 + t * (a2 + t * (a3 + t * (a4 + t * a5))))
    r = 1.0 - poly * jnp.exp(-az * az)
    return jnp.where(z < 0.0, -r, r)


def _gelu_exact(h):
    # Exact GELU: 0.5 * h * (1 + erf(h / sqrt(2)))  (torch.nn.GELU default).
    return 0.5 * h * (1.0 + _erf(h * _SQRT_HALF))


def _mlp_block(x_ref, w1_ref, b1_ref, w2_ref):
    """f32 partial sum of GELU(x @ W1_k + b1_k) @ W2_k for one hidden tile."""
    h = jnp.dot(x_ref[...], w1_ref[...], preferred_element_type=jnp.float32)
    h = h + b1_ref[...].astype(jnp.float32)
    h = _gelu_exact(h)
    # Downcast to the weight dtype (bf16 in production) before the second
    # MXU matmul; accumulation stays f32.
    return jnp.dot(h.astype(w2_ref.dtype), w2_ref[...],
                   preferred_element_type=jnp.float32)


def _mlp_kernel_inplace(x_ref, w1_ref, b1_ref, w2_ref, b2_ref, o_ref):
    """f32 output: accumulate straight into the resident output tile."""
    k = pl.program_id(2)

    @pl.when(k == 0)
    def _():
        o_ref[...] = jnp.zeros_like(o_ref)

    o_ref[...] += _mlp_block(x_ref, w1_ref, b1_ref, w2_ref)

    @pl.when(k == pl.num_programs(2) - 1)
    def _():
        o_ref[...] += b2_ref[...].astype(jnp.float32)


def _mlp_kernel_scratch(x_ref, w1_ref, b1_ref, w2_ref, b2_ref, o_ref, acc_ref):
    """Narrow output dtype: f32 VMEM accumulator, cast once at the last k."""
    k = pl.program_id(2)

    @pl.when(k == 0)
    def _():
        acc_ref[...] = jnp.zeros_like(acc_ref)

    acc_ref[...] += _mlp_block(x_ref, w1_ref, b1_ref, w2_ref)

    @pl.when(k == pl.num_programs(2) - 1)
    def _():
        o_ref[...] = (acc_ref[...] + b2_ref[...].astype(jnp.float32)
                      ).astype(o_ref.dtype)


def _pad2d(a, rows: int, cols: int):
    """Zero-pad a 2-D array; no-op (no copy) if already the right shape."""
    if a.shape == (rows, cols):
        return a
    return jnp.zeros((rows, cols), a.dtype).at[:a.shape[0], :a.shape[1]].set(a)


def mlp_pallas(x, w1, b1, w2, b2, *, compute_dtype=jnp.bfloat16,
               tm=512, tn=None, tdh=512):
    """x: (..., Din). w1: (Din, Dh), b1: (Dh,), w2: (Dh, Dout), b2: (Dout,).

    Weights are stored pre-transposed relative to PyTorch nn.Linear
    (out_features, in_features), so the kernel computes x @ W + b directly.
    Output dtype == x.dtype; matmuls run in `compute_dtype` with f32 accum.
    NOTE: for production, pre-cast/pre-pad the weights once at init instead
    of per call (here done lazily, and skipped when shapes are aligned).
    """
    orig_shape = x.shape
    d_in = orig_shape[-1]
    x2d = x.reshape(-1, d_in)
    m = x2d.shape[0]
    d_hidden = w1.shape[1]
    d_out = w2.shape[1]
    out_dtype = x.dtype

    c_isz = jnp.dtype(compute_dtype).itemsize
    o_isz = jnp.dtype(out_dtype).itemsize
    # Sub-32-bit dtypes have a (16, 128) minimum tile; f32 is (8, 128).
    min_row = 16 if (c_isz < 4 or o_isz < 4) else 8

    d_in_p = _round_up(d_in, 128)

    # ---------------- tile sizes (adaptive to the VMEM budget) -------------
    tm = max(min_row, min(tm, _round_up(m, min_row)))
    tm = _round_up(tm, min_row)
    tdh = min(tdh, _round_up(d_hidden, 128))
    tdh = _round_up(tdh, 128)
    d_out_p128 = _round_up(d_out, 128)
    if tn is None:
        # Only split Dout when it is large; otherwise one lane-dense tile.
        tn = d_out_p128 if d_out_p128 <= 2048 else 1024
    tn = min(_round_up(tn, 128), d_out_p128)

    accumulate_in_out = (out_dtype == jnp.float32)

    def vmem_footprint(tm_, tn_, tdh_):
        fb = 2 * (tm_ * d_in_p * c_isz          # x tile (dbl-buffered)
                  + d_in_p * tdh_ * c_isz       # W1 K-tile
                  + 8 * tdh_ * 4                # b1 (sublane-padded)
                  + tdh_ * tn_ * c_isz          # W2 K-tile
                  + 8 * tn_ * 4                 # b2
                  + tm_ * tn_ * o_isz)          # output tile
        if not accumulate_in_out:
            fb += tm_ * tn_ * 4                 # f32 accumulator scratch
        return fb

    # Generation-aware budget: raise toward ~100 MiB on 128-MiB parts
    # (v5e/v6e); keep headroom under v7x's 64-MiB physical VMEM.
    try:
        phys_vmem = int(pltpu.get_tpu_info().vmem_capacity_bytes)
    except Exception:
        phys_vmem = 64 * 1024 * 1024
    if phys_vmem >= 128 * 1024 * 1024:
        budget = 100 * 1024 * 1024
    else:
        budget = max(32 * 1024 * 1024,
                     min(phys_vmem - 16 * 1024 * 1024, 48 * 1024 * 1024))

    # Shrink TDH first (only changes K-step count), then TN, then TM (TM is
    # the knob that amortizes weight re-streaming, so it goes last).
    while vmem_footprint(tm, tn, tdh) > budget:
        if tdh > 128 and tdh % 256 == 0:
            tdh //= 2
        elif tn > 128 and tn % 256 == 0:
            tn //= 2
        elif tm > min_row:
            tm = _round_up(tm // 2, min_row)
        else:
            break

    m_p = _round_up(m, tm)
    # v7x megacore: give the "parallel" token axis >= 2 blocks when possible
    # so both TensorCores get work.
    if m_p // tm < 2 and tm > min_row and m > min_row:
        half = _round_up(tm // 2, min_row)
        if half < tm:
            tm = half
            m_p = _round_up(m, tm)

    dh_p = _round_up(d_hidden, tdh)
    d_out_p = _round_up(d_out, tn)
    grid = (m_p // tm, d_out_p // tn, dh_p // tdh)
    num_i, num_j, _ = grid

    # ---------------- padding / casting (exactness preserved) --------------
    # Zero padding keeps the math exact: padded Din cols hit zero W1 rows;
    # padded hidden cols have zero W1/b1 (GELU(0)=0) and zero W2 rows;
    # padded M rows / Dout cols are sliced off below.
    xp = _pad2d(x2d.astype(compute_dtype), m_p, d_in_p)
    w1p = _pad2d(w1.astype(compute_dtype), d_in_p, dh_p)
    b1p = _pad2d(b1.astype(jnp.float32).reshape(1, -1), 1, dh_p)
    w2p = _pad2d(w2.astype(compute_dtype), dh_p, d_out_p)
    b2p = _pad2d(b2.astype(jnp.float32).reshape(1, -1), 1, d_out_p)

    # Honest traffic estimate: W1/b1 re-streamed per (i, j) tile, W2/b2 per i.
    cost = pl.CostEstimate(
        flops=2 * m_p * dh_p * (num_j * d_in_p + d_out_p),
        transcendentals=m_p * dh_p * num_j,
        bytes_accessed=int(
            m_p * d_in_p * c_isz
            + num_i * num_j * (d_in_p * dh_p * c_isz + dh_p * 4)
            + num_i * (dh_p * d_out_p * c_isz + d_out_p * 4)
            + m_p * d_out_p * o_isz),
    )

    kernel = _mlp_kernel_inplace if accumulate_in_out else _mlp_kernel_scratch
    scratch = [] if accumulate_in_out else [pltpu.VMEM((tm, tn), jnp.float32)]

    out2d = pl.pallas_call(
        kernel,
        out_shape=jax.ShapeDtypeStruct((m_p, d_out_p), out_dtype),
        grid_spec=pltpu.PrefetchScalarGridSpec(
            num_scalar_prefetch=0,
            grid=grid,
            in_specs=[
                pl.BlockSpec((tm, d_in_p), lambda i, j, k: (i, 0)),    # x
                pl.BlockSpec((d_in_p, tdh), lambda i, j, k: (0, k)),   # W1
                pl.BlockSpec((1, tdh), lambda i, j, k: (0, k)),        # b1
                pl.BlockSpec((tdh, tn), lambda i, j, k: (k, j)),       # W2
                pl.BlockSpec((1, tn), lambda i, j, k: (0, j)),         # b2
            ],
            out_specs=pl.BlockSpec((tm, tn), lambda i, j, k: (i, j)),
            scratch_shapes=scratch,
        ),
        compiler_params=pltpu.CompilerParams(
            dimension_semantics=("parallel", "parallel", "arbitrary"),
            vmem_limit_bytes=int(budget),
        ),
        cost_estimate=cost,
    )(xp, w1p, b1p, w2p, b2p)

    return out2d[:m, :d_out].reshape(*orig_shape[:-1], d_out)


def init_mlp_params(key, in_features, hidden_features=None, out_features=None,
                    dtype=jnp.float32):
    """Deterministic init mirroring nn.Linear shapes (stored pre-transposed)."""
    out_features = out_features or in_features
    hidden_features = hidden_features or in_features
    k1, k2, k3, k4 = jax.random.split(key, 4)
    bound1 = 1.0 / (in_features ** 0.5)
    bound2 = 1.0 / (hidden_features ** 0.5)
    w1 = jax.random.uniform(k1, (in_features, hidden_features),
                            minval=-bound1, maxval=bound1, dtype=dtype)
    b1 = jax.random.uniform(k2, (hidden_features,),
                            minval=-bound1, maxval=bound1, dtype=dtype)
    w2 = jax.random.uniform(k3, (hidden_features, out_features),
                            minval=-bound2, maxval=bound2, dtype=dtype)
    b2 = jax.random.uniform(k4, (out_features,),
                            minval=-bound2, maxval=bound2, dtype=dtype)
    return w1, b1, w2, b2


if __name__ == "__main__":
    key = jax.random.PRNGKey(0)
    kx, kp = jax.random.split(key)

    B, S = 2, 8
    in_features, hidden_features, out_features = 32, 64, 32

    x = jax.random.normal(kx, (B, S, in_features), dtype=jnp.float32)
    w1, b1, w2, b2 = init_mlp_params(kp, in_features, hidden_features,
                                     out_features)

    # Pure-JAX f32 reference: fc2(GELU(fc1(x))); dropout p=0.0 is identity.
    ref = jax.nn.gelu(x.reshape(-1, in_features) @ w1 + b1,
                      approximate=False) @ w2 + b2
    ref = ref.reshape(B, S, out_features)

    # 1) f32 MXU path (in-place f32 accumulation into the output tile).
    y32 = mlp_pallas(x, w1, b1, w2, b2, compute_dtype=jnp.float32)
    jax.block_until_ready(y32)
    assert y32.shape == (B, S, out_features)
    assert jnp.allclose(y32, ref, atol=1e-2, rtol=1e-2)

    # 2) Production default: bf16 MXU datapath, f32 accumulation, f32 output.
    y16 = mlp_pallas(x, w1, b1, w2, b2, compute_dtype=jnp.bfloat16)
    jax.block_until_ready(y16)
    assert y16.shape == (B, S, out_features)
    assert jnp.allclose(y16, ref, atol=3e-2, rtol=3e-2)

    # 3) bf16 activations in/out (exercises the f32-scratch accumulator path).
    y16io = mlp_pallas(x.astype(jnp.bfloat16), w1, b1, w2, b2,
                       compute_dtype=jnp.bfloat16)
    jax.block_until_ready(y16io)
    assert y16io.dtype == jnp.bfloat16
    assert jnp.allclose(y16io.astype(jnp.float32), ref, atol=5e-2, rtol=5e-2)

    print("KERNEL_OK")
</pallas_src>

<mosaic_0001>
module attributes {stable_mosaic.version = 11 : i64} {
  func.func @_mlp_kernel_inplace(%arg0: i32, %arg1: i32, %arg2: i32, %arg3: memref<8x128xf32, #tpu.memory_space<vmem>>, %arg4: memref<128x128xf32, #tpu.memory_space<vmem>>, %arg5: memref<1x128xf32, #tpu.memory_space<vmem>>, %arg6: memref<128x128xf32, #tpu.memory_space<vmem>>, %arg7: memref<1x128xf32, #tpu.memory_space<vmem>>, %arg8: memref<8x128xf32, #tpu.memory_space<vmem>>) attributes {dimension_semantics = [#tpu.dimension_semantics<parallel>, #tpu.dimension_semantics<parallel>, #tpu.dimension_semantics<arbitrary>], iteration_bounds = array<i64: 2, 1, 1>, scalar_prefetch = 0 : i64, scratch_operands = 0 : i64, tpu.core_type = #tpu.core_type<tc>, window_params = [{transform_indices = @transform_0, window_bounds = array<i64: 8, 128>}, {transform_indices = @transform_1, window_bounds = array<i64: 128, 128>}, {transform_indices = @transform_2, window_bounds = array<i64: 1, 128>}, {transform_indices = @transform_3, window_bounds = array<i64: 128, 128>}, {transform_indices = @transform_4, window_bounds = array<i64: 1, 128>}, {transform_indices = @transform_5, window_bounds = array<i64: 8, 128>}]} {
    %c0_i32 = arith.constant 0 : i32
    %0 = arith.cmpi eq, %arg2, %c0_i32 : i32
    %1 = arith.extui %0 : i1 to i32
    %c0_i32_0 = arith.constant 0 : i32
    %2 = arith.cmpi ne, %1, %c0_i32_0 : i32
    scf.if %2 {
      %cst_30 = arith.constant 0.000000e+00 : f32
      %57 = vector.broadcast %cst_30 : f32 to vector<8x128xf32>
      %c0_31 = arith.constant 0 : index
      %c0_32 = arith.constant 0 : index
      %58 = vector.load %arg8[%c0_31, %c0_32] : memref<8x128xf32, #tpu.memory_space<vmem>>, vector<8x128xf32>
      tpu.vector_store %arg8[%c0_31, %c0_32], %57 {strides = array<i32>} : memref<8x128xf32, #tpu.memory_space<vmem>>, vector<8x128xf32>,
    } else {
    }
    %c0 = arith.constant 0 : index
    %c0_1 = arith.constant 0 : index
    %3 = vector.load %arg8[%c0, %c0_1] : memref<8x128xf32, #tpu.memory_space<vmem>>, vector<8x128xf32>
    %c0_2 = arith.constant 0 : index
    %c0_3 = arith.constant 0 : index
    %4 = vector.load %arg3[%c0_2, %c0_3] : memref<8x128xf32, #tpu.memory_space<vmem>>, vector<8x128xf32>
    %c0_4 = arith.constant 0 : index
    %c0_5 = arith.constant 0 : index
    %5 = vector.load %arg4[%c0_4, %c0_5] : memref<128x128xf32, #tpu.memory_space<vmem>>, vector<128x128xf32>
    %cst = arith.constant dense<0.000000e+00> : vector<8x128xf32>
    %6 = tpu.matmul %4, %5, %cst {dimension_numbers = #tpu.dot_dimension_numbers<[1], [0], [0], [1], [0, 0, 1, 1], [], []>} : vector<8x128xf32>, vector<128x128xf32>, vector<8x128xf32> -> vector<8x128xf32>
    %c0_6 = arith.constant 0 : index
    %c0_7 = arith.constant 0 : index
    %7 = vector.load %arg5[%c0_6, %c0_7] : memref<1x128xf32, #tpu.memory_space<vmem>>, vector<1x128xf32>
    %8 = vector.broadcast %7 : vector<1x128xf32> to vector<8x128xf32>
    %9 = arith.addf %6, %8 : vector<8x128xf32>
    %cst_8 = arith.constant 5.000000e-01 : f32
    %10 = vector.broadcast %cst_8 : f32 to vector<8x128xf32>
    %11 = arith.mulf %10, %9 : vector<8x128xf32>
    %cst_9 = arith.constant 0.707106769 : f32
    %12 = vector.broadcast %cst_9 : f32 to vector<8x128xf32>
    %13 = arith.mulf %9, %12 : vector<8x128xf32>
    %14 = math.absf %13 : vector<8x128xf32>
    %cst_10 = arith.constant 0.327591091 : f32
    %15 = vector.broadcast %cst_10 : f32 to vector<8x128xf32>
    %16 = arith.mulf %15, %14 : vector<8x128xf32>
    %cst_11 = arith.constant 1.000000e+00 : f32
    %17 = vector.broadcast %cst_11 : f32 to vector<8x128xf32>
    %18 = arith.addf %17, %16 : vector<8x128xf32>
    %cst_12 = arith.constant 1.000000e+00 : f32
    %19 = vector.broadcast %cst_12 : f32 to vector<8x128xf32>
    %20 = arith.divf %19, %18 : vector<8x128xf32>
    %cst_13 = arith.constant 1.06140542 : f32
    %21 = vector.broadcast %cst_13 : f32 to vector<8x128xf32>
    %22 = arith.mulf %20, %21 : vector<8x128xf32>
    %cst_14 = arith.constant -1.45315206 : f32
    %23 = vector.broadcast %cst_14 : f32 to vector<8x128xf32>
    %24 = arith.addf %23, %22 : vector<8x128xf32>
    %25 = arith.mulf %20, %24 : vector<8x128xf32>
    %cst_15 = arith.constant 1.42141378 : f32
    %26 = vector.broadcast %cst_15 : f32 to vector<8x128xf32>
    %27 = arith.addf %26, %25 : vector<8x128xf32>
    %28 = arith.mulf %20, %27 : vector<8x128xf32>
    %cst_16 = arith.constant -0.284496725 : f32
    %29 = vector.broadcast %cst_16 : f32 to vector<8x128xf32>
    %30 = arith.addf %29, %28 : vector<8x128xf32>
    %31 = arith.mulf %20, %30 : vector<8x128xf32>
    %cst_17 = arith.constant 0.254829586 : f32
    %32 = vector.broadcast %cst_17 : f32 to vector<8x128xf32>
    %33 = arith.addf %32, %31 : vector<8x128xf32>
    %34 = arith.mulf %20, %33 : vector<8x128xf32>
    %cst_18 = arith.constant 0.000000e+00 : f32
    %35 = vector.broadcast %cst_18 : f32 to vector<8x128xf32>
    %36 = arith.subf %35, %14 : vector<8x128xf32>
    %37 = arith.mulf %36, %14 : vector<8x128xf32>
    %38 = math.exp %37 : vector<8x128xf32>
    %39 = arith.mulf %34, %38 : vector<8x128xf32>
    %cst_19 = arith.constant 1.000000e+00 : f32
    %40 = vector.broadcast %cst_19 : f32 to vector<8x128xf32>
    %41 = arith.subf %40, %39 : vector<8x128xf32>
    %cst_20 = arith.constant 0.000000e+00 : f32
    %42 = vector.broadcast %cst_20 : f32 to vector<8x128xf32>
    %43 = arith.cmpf olt, %13, %42 : vector<8x128xf32>
    %cst_21 = arith.constant 0.000000e+00 : f32
    %44 = vector.broadcast %cst_21 : f32 to vector<8x128xf32>
    %45 = arith.subf %44, %41 : vector<8x128xf32>
    %46 = arith.select %43, %45, %41 : vector<8x128xi1>, vector<8x128xf32>
    %cst_22 = arith.constant 1.000000e+00 : f32
    %47 = vector.broadcast %cst_22 : f32 to vector<8x128xf32>
    %48 = arith.addf %47, %46 : vector<8x128xf32>
    %49 = arith.mulf %11, %48 : vector<8x128xf32>
    %c0_23 = arith.constant 0 : index
    %c0_24 = arith.constant 0 : index
    %50 = vector.load %arg6[%c0_23, %c0_24] : memref<128x128xf32, #tpu.memory_space<vmem>>, vector<128x128xf32>
    %cst_25 = arith.constant dense<0.000000e+00> : vector<8x128xf32>
    %51 = tpu.matmul %49, %50, %cst_25 {dimension_numbers = #tpu.dot_dimension_numbers<[1], [0], [0], [1], [0, 0, 1, 1], [], []>} : vector<8x128xf32>, vector<128x128xf32>, vector<8x128xf32> -> vector<8x128xf32>
    %52 = arith.addf %3, %51 : vector<8x128xf32>
    %c0_26 = arith.constant 0 : index
    %c0_27 = arith.constant 0 : index
    %53 = vector.load %arg8[%c0_26, %c0_27] : memref<8x128xf32, #tpu.memory_space<vmem>>, vector<8x128xf32>
    tpu.vector_store %arg8[%c0_26, %c0_27], %52 {strides = array<i32>} : memref<8x128xf32, #tpu.memory_space<vmem>>, vector<8x128xf32>,
    %c0_i32_28 = arith.constant 0 : i32
    %54 = arith.cmpi eq, %arg2, %c0_i32_28 : i32
    %55 = arith.extui %54 : i1 to i32
    %c0_i32_29 = arith.constant 0 : i32
    %56 = arith.cmpi ne, %55, %c0_i32_29 : i32
    scf.if %56 {
      %c0_30 = arith.constant 0 : index
      %c0_31 = arith.constant 0 : index
      %57 = vector.load %arg8[%c0_30, %c0_31] : memref<8x128xf32, #tpu.memory_space<vmem>>, vector<8x128xf32>
      %c0_32 = arith.constant 0 : index
      %c0_33 = arith.constant 0 : index
      %58 = vector.load %arg7[%c0_32, %c0_33] : memref<1x128xf32, #tpu.memory_space<vmem>>, vector<1x128xf32>
      %59 = vector.broadcast %58 : vector<1x128xf32> to vector<8x128xf32>
      %60 = arith.addf %57, %59 : vector<8x128xf32>
      %c0_34 = arith.constant 0 : index
      %c0_35 = arith.constant 0 : index
      %61 = vector.load %arg8[%c0_34, %c0_35] : memref<8x128xf32, #tpu.memory_space<vmem>>, vector<8x128xf32>
      tpu.vector_store %arg8[%c0_34, %c0_35], %60 {strides = array<i32>} : memref<8x128xf32, #tpu.memory_space<vmem>>, vector<8x128xf32>,
    } else {
    }
    return
  }
  func.func @transform_0(%arg0: i32, %arg1: i32, %arg2: i32) -> (i32, i32) {
    %c0_i32 = arith.constant 0 : i32
    %c0_i32_0 = arith.constant 0 : i32
    return %arg0, %c0_i32 : i32, i32
  }
  func.func @transform_1(%arg0: i32, %arg1: i32, %arg2: i32) -> (i32, i32) {
    %c0_i32 = arith.constant 0 : i32
    %c0_i32_0 = arith.constant 0 : i32
    return %c0_i32, %arg2 : i32, i32
  }
  func.func @transform_2(%arg0: i32, %arg1: i32, %arg2: i32) -> (i32, i32) {
    %c0_i32 = arith.constant 0 : i32
    %c0_i32_0 = arith.constant 0 : i32
    return %c0_i32, %arg2 : i32, i32
  }
  func.func @transform_3(%arg0: i32, %arg1: i32, %arg2: i32) -> (i32, i32) {
    %c0_i32 = arith.constant 0 : i32
    return %arg2, %arg1 : i32, i32
  }
  func.func @transform_4(%arg0: i32, %arg1: i32, %arg2: i32) -> (i32, i32) {
    %c0_i32 = arith.constant 0 : i32
    %c0_i32_0 = arith.constant 0 : i32
    return %c0_i32, %arg1 : i32, i32
  }
  func.func @transform_5(%arg0: i32, %arg1: i32, %arg2: i32) -> (i32, i32) {
    %c0_i32 = arith.constant 0 : i32
    return %arg0, %arg1 : i32, i32
  }
}

</mosaic_0001>

<bundles_post_ra>
// kernel: tpu_custom_call.1
= control target key start
LH: loop header
LB: loop body
LE: loop exit
PB: predicated region body
PF: predicated region fallthrough
CT: control target
= control target key end

     0   :  { %10 = vsyncpa [#allocation3], 0  ;;  %s1468_s0 = inlined_call_operand.hbm [shape: f32[16,128], index: 0, kind: input, shape index: {}]   ;;  %s1469_s1 = inlined_call_operand.hbm [shape: f32[128,128], index: 1, kind: input, shape index: {}]   ;;  %s1470_s2 = inlined_call_operand.vmem [shape: f32[1,128], index: 2, kind: input, shape index: {}]   ;;  %s1471_s3 = inlined_call_operand.hbm [shape: f32[128,128], index: 3, kind: input, shape index: {}]   ;;  %s1472_s4 = inlined_call_operand.vmem [shape: f32[1,128], index: 4, kind: input, shape index: {}]   ;;  %s1473_s5 = inlined_call_operand.hbm [shape: f32[16,128], index: 5, kind: output, shape index: {}]  }
   0x1   :  { %12 = vsyncpa [#allocation3 + $0x1], 0 }
   0x2   :  { %13 = vsyncpa [#allocation6], 0 }
   0x3   :  { %14 = vsyncpa [#allocation4], 0 }
   0x4   :  { %16 = vsyncpa [#allocation4 + $0x1], 0  ;;  %s1189_s18 = smov 0   ;;  %s1191_s19 = smov 0  }
   0x5   :  { %s1193_s20 = smov 0   ;;  %s1195_s21 = smov 0  }
   0x6   :  { %s1197_s22 = smov 0   ;;  %s1199_s23 = smov 0  }
   0x7 LB: > { %s711_s24 = sadd.s32 4294967295, %s1148_s23   ;;  %s712_s25 = sadd.s32 4294967294, %s1148_s23   ;;  %s1148_s23 = sphi %s1199_s23, %s22_s23   ;;  %s1144_s22 = sphi %s1197_s22, %s1495_s22   ;;  %s1140_s21 = sphi %s1195_s21, %s1494_s21   ;;  %s1136_s20 = sphi %s1193_s20, %s1493_s20   ;;  %s1132_s19 = sphi %s1191_s19, %s1492_s19   ;;  %s1128_s18 = sphi %s1189_s18, %s1491_s18  }
   0x8   : > { %p61_p0 = scmp.ne.s32.totalorder %s1132_s19, %s1128_s18  ;;  %p1223_p1 = scmp.eq.s32.totalorder %s711_s24, 0 }
   0x9   : > { %p1227_p2 = scmp.eq.s32.totalorder %s711_s24, 1  ;;  %p199_p3 = scmp.eq.s32.totalorder %s712_s25, 1 }
   0xa   : > { %s1478_s26 = scalar_select %p1223_p1, 1, 0 }
   0xb   : > { %p1233_p4 = por %p1223_p1, %p61_p0  ;;  %p713_p5 = scmp.ge.s32.totalorder %s1148_s23, 1 }
   0xc   : > { %p1238_p6 = por %p199_p3, %p61_p0  ;;  %p206_p7 = scmp.lt.s32.totalorder %s1148_s23, 3 }
   0xd   : > { %s1480_s28 = scalar_select %p1233_p4, 1, 0 }
   0xe   : > { %s1481_s29 = scalar_select %p1238_p6, 1, 0 }
   0xf   : > { %p1243_p8 = pnand %p713_p5, %p206_p7  ;;  %s1150_s6 = smov [#allocation5]  }
  0x10   : > { %s220_s7 = sshll.u32 %s1150_s6, 4  ;;  %s1151_s9 = smov [#allocation7]   ;;  %s1247_s7 = int_to_ptr.vmem [resolvable:$true] %s220_s7 }
  0x11   : > { %p896_p9 = pneg %p1243_p8  ;;  %s243_s10 = sshll.u32 %s1151_s9, 4  ;;  %s1258_s10 = int_to_ptr.vmem [resolvable:$true] %s243_s10 }
  0x12   : > { %s976_s13 = scalar_lea.hbm %s1469_s1, 2048 }
  0x13   : > { %p1254_p11 = pnand %p896_p9, %p1223_p1  ;;  %p977_p12 = scmp.ne.s32.totalorder %s1469_s1, %s976_s13 }
  0x14   : > { %p983_p5 = scmp.lt.u32.totalorder %s976_s13, %s1469_s1 }
  0x15   : > { %p978_p13 = pneg %p1254_p11 }
  0x17   : > { %p979_p0 = pnand %p978_p13, %p977_p12 }
  0x19   : > { %p980_p3 = pneg %p979_p0 }
  0x1b   : > { %p985_p7 = pnand %p983_p5, %p980_p3 }
  0x1d   : > { %988 = shalt.err (!%p985_p7)
}
  0x1e   : > { %s989_s24 = scalar_lea.vmem %s1247_s7, 2048  ;;  %p997_p1 = scmp.lt.s32.totalorder %s1247_s7, %s1247_s7 }
  0x1f   : > { %p990_p9 = scmp.ne.s32.totalorder %s1247_s7, %s989_s24  ;;  %p998_p12 = scmp.lt.s32.totalorder %s989_s24, %s989_s24 }
  0x21   : > { %p992_p10 = pnand %p990_p9, %p978_p13  ;;  %p999_p0 = por %p998_p12, %p997_p1 }
  0x23   : > { %p993_p6 = pneg %p992_p10 }
  0x25   : > { %p1000_p4 = pnand %p999_p0, %p993_p6 }
  0x27   : > { %1003 = shalt.err (!%p1000_p4)
}
  0x28   : > { %s1152_s25 = smov 128   ;;  %s1153_s6 = smov 8  }
  0x29   : > { %899 = dma.hbm_to_vmem [thread:$0]  (!%p1254_p11), %s1469_s1, 2048, %s1247_s7, [#allocation6], %s1152_s25, %s1152_s25, %s1153_s6  }
  0x2a   : > { %s1004_s14 = scalar_lea.hbm %s1471_s3, 2048 }
  0x2b   : > { %p1005_p1 = scmp.ne.s32.totalorder %s1471_s3, %s1004_s14  ;;  %p1011_p10 = scmp.lt.u32.totalorder %s1004_s14, %s1471_s3 }
  0x2d   : > { %p1007_p4 = pnand %p1005_p1, %p978_p13 }
  0x2f   : > { %p1008_p6 = pneg %p1007_p4 }
  0x31   : > { %p1013_p3 = pnand %p1011_p10, %p1008_p6 }
  0x33   : > { %1016 = shalt.err (!%p1013_p3)
}
  0x34   : > { %s1017_s7 = scalar_lea.vmem %s1258_s10, 2048  ;;  %p1025_p12 = scmp.lt.s32.totalorder %s1258_s10, %s1258_s10 }
  0x35   : > { %p1018_p5 = scmp.ne.s32.totalorder %s1258_s10, %s1017_s7  ;;  %p1026_p0 = scmp.lt.s32.totalorder %s1017_s7, %s1017_s7 }
  0x37   : > { %p1020_p7 = pnand %p1018_p5, %p978_p13  ;;  %p1027_p1 = por %p1026_p0, %p1025_p12 }
  0x39   : > { %p1021_p9 = pneg %p1020_p7 }
  0x3b   : > { %p1028_p4 = pnand %p1027_p1, %p1021_p9 }
  0x3d   : > { %1031 = shalt.err (!%p1028_p4)
}
  0x3e   : > { %902 = dma.hbm_to_vmem [thread:$0]  (!%p1254_p11), %s1471_s3, 2048, %s1258_s10, [#allocation6], %s1152_s25, %s1152_s25, %s1153_s6  }
  0x3f   : > { %s41_s12 = sadd.s32 1, %s1144_s22  ;;  %s48_s13 = sadd.s32 1, %s1136_s20 }
  0x40   : > { %p43_p13 = scmp.ge.s32.totalorder %s41_s12, 2  ;;  %p55_p6 = scmp.ne.s32.totalorder %s1136_s20, %s1132_s19 }
  0x41   : > { %p56_p10 = scmp.eq.s32.totalorder %s1148_s23, 0  ;;  %p913_p3 = scmp.lt.s32.totalorder %s1148_s23, 2 }
  0x42   : > { %s1497_s12 = smov (%p43_p13, %s41_s12), 0  ;;  %p1322_p7 = por %p1227_p2, %p55_p6 }
  0x43   : > { %p57_p5 = por %p56_p10, %p55_p6  ;;  %s45_s14 = ssub.s32 %s1144_s22, %s1497_s12 }
  0x44   : > { %s1484_s8 = scalar_select %p1322_p7, 1, 0 }
  0x45   : > { %s263_s15 = sand.u32 1, %s1136_s20   ;;  %p46_p9 = scmp.eq.s32.totalorder %s45_s14, 0 }
  0x46   : > { %s719_s10 = sshll.u32 %s263_s15, 3  ;;  %s720_s25 = sshll.u32 %s1144_s22, 7 }
  0x47   : > { %s1331_s6 = scalar_select %p46_p9, %s1136_s20, %s48_s13  }
  0x48   : > { %s1336_s24 = scalar_lea.hbm %s1468_s0, %s720_s25  ;;  %s267_s27 = scalar_lea.vmem [#allocation2], %s719_s10 }
  0x49   : > { %s274_s7 = sshll.u32 %s267_s27, 4  ;;  %p1340_p2 = pnand %p913_p3, %p57_p5  ;;  %s1344_s7 = int_to_ptr.vmem [resolvable:$true] %s274_s7 }
  0x4a   : > { %s264_s11 = scalar_lea.sflag [#allocation3], %s263_s15  ;;  %s1032_s13 = scalar_lea.hbm %s1336_s24, 128 }
  0x4b   : > { %p1033_p11 = scmp.ne.s32.totalorder %s1336_s24, %s1032_s13  ;;  %p1034_p12 = pneg %p1340_p2 }
  0x4c   : > { %s1037_s25 = scalar_lea.hbm %s1468_s0, 256  ;;  %p1038_p4 = scmp.lt.u32.totalorder %s1336_s24, %s1468_s0 }
  0x4d   : > { %p1035_p0 = pnand %p1034_p12, %p1033_p11  ;;  %p1039_p13 = scmp.lt.u32.totalorder %s1037_s25, %s1032_s13 }
  0x4e   : > { %p1041_p10 = scmp.lt.u32.totalorder %s1032_s13, %s1336_s24 }
  0x4f   : > { %p1036_p1 = pneg %p1035_p0  ;;  %p1040_p6 = por %p1039_p13, %p1038_p4 }
  0x51   : > { %p1042_p3 = por %p1041_p10, %p1040_p6 }
  0x53   : > { %p1043_p5 = pnand %p1042_p3, %p1036_p1 }
  0x55   : > { %1046 = shalt.err (!%p1043_p5)
}
  0x56   : > { %s1047_s15 = scalar_lea.vmem %s1344_s7, 128  ;;  %s1154_s27 = smov [#allocation2]  }
  0x57   : > { %p1048_p9 = scmp.ne.s32.totalorder %s1344_s7, %s1047_s15  ;;  %s1052_s14 = sshll.u32 %s1154_s27, 4  ;;  %s1053_s14 = int_to_ptr.vmem [resolvable:$false] %s1052_s14 }
  0x58   : > { %s1054_s10 = scalar_lea.vmem %s1053_s14, 256  ;;  %p1055_p7 = scmp.lt.s32.totalorder %s1344_s7, %s1053_s14 }
  0x59   : > { %p1050_p11 = pnand %p1048_p9, %p1034_p12  ;;  %p1056_p4 = scmp.lt.s32.totalorder %s1054_s10, %s1047_s15 }
  0x5b   : > { %p1051_p0 = pneg %p1050_p11  ;;  %p1057_p13 = por %p1056_p4, %p1055_p7 }
  0x5d   : > { %p1058_p6 = pnand %p1057_p13, %p1051_p0 }
  0x5f   : > { %1061 = shalt.err (!%p1058_p6)
}
  0x60   : > { %906 = dma.hbm_to_vmem [thread:$0]  (!%p1340_p2), %s1336_s24, 128, %s1344_s7, %s264_s11  }
  0x61   : > { %283 = sbr.rel (%p1243_p8) target bundleno = 633 (0x279), region = 40  ;;  %s1374_s13 = sand.u32 (!%p1243_p8), 1, %s1132_s19  }
  0x62   : > { %s722_s25 = sshll.u32 (!%p1243_p8), %s1374_s13, 3  ;;  %s286_s16 = scalar_lea.sflag (!%p1243_p8), [#allocation3], %s1374_s13 }
  0x63   : > { %s1380_s17 = scalar_lea.vmem (!%p1243_p8), [#allocation2], %s722_s25  ;;  %p1486_p7 = scmp.ne.s32.totalorder (!%p1243_p8), %s1480_s28, 0 }
  0x68   : > { %1115 = dma.done.wait (%p1486_p7), %s286_s16, 128  }
  0x69   : > { %1117 = vsyncadd (%p1486_p7), %s286_s16, 4294967168  ;;  %p1487_p2 = scmp.ne.s32.totalorder %s1478_s26, 0 }
  0x6b   : > { %1119 = dma.done.wait (%p1487_p2), [#allocation6], 4096  }
  0x6c   : > { %1121 = vsyncadd (%p1487_p2), [#allocation6], 4294963200  ;;  %v1155_v0 = vmov 0.0|0.0   ;;  %vm1156_vm0 = vmmov 0   ;;  %v1157_v1 = vmov 0.0   ;;  %v344_v2 = vld [vmem:[#allocation5] sm:$0xff] }
  0x6d   : > { %836 = vmatprep.subr.bf16.mxu0 %v1155_v0  ;;  %798 = vmatprep.mubr.msk.f32.mxu0 %vm1156_vm0, %v1157_v1  ;;  %v345_v3 = vld [vmem:[#allocation5 + $0x8] sm:$0xff]  ;;  %v346_v4 = vld [vmem:[#allocation5 + $0x10] sm:$0xff]  ;;  %v347_v6 = vld [vmem:[#allocation5 + $0x18] sm:$0xff]  ;;  %s729_s7 = sshll.u32 %s1140_s21, 7  ;;  %s329_s9 = scalar_lea.vmem [#allocation8], %s722_s25 }
  0x6e   : > { %860 = vmatprep.subr.bf16.mxu1 %v1155_v0  ;;  %833 = vmatprep.mubr.msk.f32.mxu1 %vm1156_vm0, %v1157_v1  ;;  %v837_v5 = vpack.c.bf16 %v345_v3, %v344_v2  ;;  %v840_v7 = vpack.c.bf16 %v347_v6, %v346_v4  ;;  %v348_v8 = vld [vmem:[#allocation5 + $0x20] sm:$0xff]  ;;  %v349_v9 = vld [vmem:[#allocation5 + $0x28] sm:$0xff]  ;;  %v350_v11 = vld [vmem:[#allocation5 + $0x30] sm:$0xff]  ;;  %s580_s11 = sshll.u32 %s329_s9, 4  ;;  %s1419_s14 = scalar_lea.hbm %s1473_s5, %s729_s7  ;;  %s1421_s11 = int_to_ptr.vmem [resolvable:$true] %s580_s11 }
  0x6f   : > { %v843_v10 = vpack.c.bf16 %v349_v9, %v348_v8  ;;  %v351_v12 = vld [vmem:[#allocation5 + $0x38] sm:$0xff]  ;;  %v352_v14 = vld [vmem:[#allocation5 + $0x40] sm:$0xff]  ;;  %v353_v15 = vld [vmem:[#allocation5 + $0x48] sm:$0xff]  ;;  %s566_s10 = scalar_lea.sflag [#allocation4], %s1374_s13  ;;  %s1062_s16 = scalar_lea.vmem %s1421_s11, 128 }
  0x70   : > { %838 = vmatpush3.bf16.msra.mxu0 %v837_v5  ;;  %v846_v13 = vpack.c.bf16 %v351_v12, %v350_v11  ;;  %v849_v16 = vpack.c.bf16 %v353_v15, %v352_v14  ;;  %v354_v17 = vld [vmem:[#allocation5 + $0x50] sm:$0xff]  ;;  %v355_v18 = vld [vmem:[#allocation5 + $0x58] sm:$0xff]  ;;  %v356_v20 = vld [vmem:[#allocation5 + $0x60] sm:$0xff]  ;;  %p1063_p8 = scmp.ne.s32.totalorder %s1421_s11, %s1062_s16  ;;  %p1488_p12 = scmp.ne.s32.totalorder %s1484_s8, 0 }
  0x71   : > { %839 = vmatprep.subr.bf16.mxu0 %v1155_v0  ;;  %v852_v19 = vpack.c.bf16 %v355_v18, %v354_v17  ;;  %v357_v21 = vld [vmem:[#allocation5 + $0x68] sm:$0xff]  ;;  %v358_v23 = vld [vmem:[#allocation5 + $0x70] sm:$0xff]  ;;  %v359_v24 = vld [vmem:[#allocation5 + $0x78] sm:$0xff]  ;;  %s1158_s21 = smov [#allocation8]  }
  0x72   : > { %v855_v22 = vpack.c.bf16 %v357_v21, %v356_v20  ;;  %v858_v25 = vpack.c.bf16 %v359_v24, %v358_v23  ;;  %v343_v26 = vld [vmem:[%s1380_s17] sm:$0xff]  ;;  %v464_v27 = vld [vmem:[#allocation7] sm:$0xff]  ;;  %v465_v28 = vld [vmem:[#allocation7 + $0x8] sm:$0xff]  ;;  %p1064_p1 = pnand %p1063_p8, %p1488_p12  ;;  %s1066_s25 = sshll.u32 %s1158_s21, 4  ;;  %s1067_s25 = int_to_ptr.vmem [resolvable:$false] %s1066_s25 }
  0x73   : > { %v466_v29 = vld [vmem:[#allocation7 + $0x10] sm:$0xff]  ;;  %v861_v30 = vpack.c.bf16 %v465_v28, %v464_v27  ;;  %v467_v31 = vld [vmem:[#allocation7 + $0x18] sm:$0xff]  ;;  %v468_v33 = vld [vmem:[#allocation7 + $0x20] sm:$0xff]  ;;  %s1068_s17 = scalar_lea.vmem %s1067_s25, 256  ;;  %p1069_p3 = scmp.lt.s32.totalorder %s1421_s11, %s1067_s25 }
  0x74   : > { %841 = vmatpush3.bf16.msra.mxu0 %v840_v7  ;;  %v864_v32 = vpack.c.bf16 %v467_v31, %v466_v29  ;;  %v469_v34 = vld [vmem:[#allocation7 + $0x28] sm:$0xff]  ;;  %v470_v36 = vld [vmem:[#allocation7 + $0x30] sm:$0xff]  ;;  %v471_v37 = vld [vmem:[#allocation7 + $0x38] sm:$0xff]  ;;  %p1065_p10 = pneg %p1064_p1  ;;  %p1070_p5 = scmp.lt.s32.totalorder %s1068_s17, %s1062_s16 }
  0x75   : > { %842 = vmatprep.subr.bf16.mxu0 %v1155_v0  ;;  %862 = vmatpush3.bf16.msra.mxu1 %v861_v30  ;;  %v867_v35 = vpack.c.bf16 %v469_v34, %v468_v33  ;;  %v870_v38 = vpack.c.bf16 %v471_v37, %v470_v36  ;;  %v472_v39 = vld [vmem:[#allocation7 + $0x40] sm:$0xff]  ;;  %v473_v40 = vld [vmem:[#allocation7 + $0x48] sm:$0xff]  ;;  %v474_v42 = vld [vmem:[#allocation7 + $0x50] sm:$0xff] }
  0x76   : > { %863 = vmatprep.subr.bf16.mxu1 %v1155_v0  ;;  %v873_v41 = vpack.c.bf16 %v473_v40, %v472_v39  ;;  %v475_v43 = vld [vmem:[#allocation7 + $0x58] sm:$0xff]  ;;  %v476_v45 = vld [vmem:[#allocation7 + $0x60] sm:$0xff]  ;;  %v477_v46 = vld [vmem:[#allocation7 + $0x68] sm:$0xff]  ;;  %p1071_p9 = por %p1070_p5, %p1069_p3 }
  0x77   : > { %v876_v44 = vpack.c.bf16 %v475_v43, %v474_v42  ;;  %v879_v47 = vpack.c.bf16 %v477_v46, %v476_v45  ;;  %v478_v48 = vld [vmem:[#allocation7 + $0x70] sm:$0xff]  ;;  %v479_v49 = vld [vmem:[#allocation7 + $0x78] sm:$0xff] }
  0x78   : > { %844 = vmatpush3.bf16.msra.mxu0 %v843_v10  ;;  %v882_v50 = vpack.c.bf16 %v479_v49, %v478_v48  ;;  %v726_v51 = vld [vmem:[%s1470_s2] ss:$0 sm:$0xff]  ;;  %p1072_p11 = pnand %p1071_p9, %p1065_p10 }
  0x79   : > { %845 = vmatprep.subr.bf16.mxu0 %v1155_v0  ;;  %865 = vmatpush3.bf16.msra.mxu1 %v864_v32  ;;  %v727_v17 = vld [vmem:[%s1472_s4] ss:$0 sm:$0xff] }
  0x7a   : > { %866 = vmatprep.subr.bf16.mxu1 %v1155_v0 }
  0x7c   : > { %847 = vmatpush3.bf16.msra.mxu0 %v846_v13 }
  0x7d   : > { %848 = vmatprep.subr.bf16.mxu0 %v1155_v0  ;;  %868 = vmatpush3.bf16.msra.mxu1 %v867_v35 }
  0x7e   : > { %869 = vmatprep.subr.bf16.mxu1 %v1155_v0 }
  0x80   : > { %850 = vmatpush3.bf16.msra.mxu0 %v849_v16 }
  0x81   : > { %851 = vmatprep.subr.bf16.mxu0 %v1155_v0  ;;  %871 = vmatpush3.bf16.msra.mxu1 %v870_v38 }
  0x82   : > { %872 = vmatprep.subr.bf16.mxu1 %v1155_v0 }
  0x84   : > { %853 = vmatpush3.bf16.msra.mxu0 %v852_v19 }
  0x85   : > { %854 = vmatprep.subr.bf16.mxu0 %v1155_v0  ;;  %874 = vmatpush3.bf16.msra.mxu1 %v873_v41 }
  0x86   : > { %875 = vmatprep.subr.bf16.mxu1 %v1155_v0 }
  0x88   : > { %856 = vmatpush3.bf16.msra.mxu0 %v855_v22 }
  0x89   : > { %857 = vmatprep.subr.bf16.mxu0 %v1155_v0  ;;  %877 = vmatpush3.bf16.msra.mxu1 %v876_v44 }
  0x8a   : > { %878 = vmatprep.subr.bf16.mxu1 %v1155_v0 }
  0x8c   : > { %859 = vmatpush3.bf16.msra.mxu0 %v858_v25 }
  0x8d   : > { %880 = vmatpush3.bf16.msra.mxu1 %v879_v47 }
  0x8e   : > { %881 = vmatprep.subr.bf16.mxu1 %v1155_v0 }
  0x8f   : > { %799 = vmatmul.mubr.f32.vlgmr.msra.gmra.mrb[0].mxu0 %v343_v26 }
  0x91   : > { %883 = vmatpush3.bf16.msra.mxu1 %v882_v50 }
 0x162   : > { %v433_v52 = vpop.f32.mrb[0].mxu0 }
 0x163   : > { %v434_v53 = vadd.f32 %v726_v51, %v433_v52  ;;  %v800_v54 = vpop.f32.mrb[1].mxu0 }
 0x165   : > { %v438_v55 = vmul.f32 0.70710677, %v434_v53  ;;  %v437_v13 = vmul.f32 0.5, %v434_v53 }
 0x167   : > { %v439_v56 = vand.u32 2147483647, %v438_v55  ;;  %vm459_vm1 = vcmp.lt.f32.partialorder %v438_v55, 0.0 }
 0x169   : > { %v440_v57 = vmul.f32 0.3275911, %v439_v56  ;;  %v453_v59 = vsub.f32 0.0, %v439_v56 }
 0x16b   : > { %v441_v58 = vadd.f32 1.0, %v440_v57  ;;  %v454_v61 = vmul.f32 %v453_v59, %v439_v56 }
 0x16d   : > { %972 = vrcp.f32 %v441_v58  ;;  %v455_v1 = vmul.f32 1.442695, %v454_v61 }
 0x16f   : > { %974 = vpow2.f32 %v455_v1 }
 0x177   : > { %v973_v60 = vpop.eup %972 }
 0x178   : > { %v444_v62 = vmul.f32 1.0614054, %v973_v60 }
 0x179   : > { %v975_v8 = vpop.eup %974 }
 0x17a   : > { %v445_v63 = vadd.f32 -1.4531521, %v444_v62 }
 0x17c   : > { %v446_v0 = vmul.f32 %v973_v60, %v445_v63 }
 0x17e   : > { %v447_v2 = vadd.f32 1.4214138, %v446_v0 }
 0x180   : > { %v448_v3 = vmul.f32 %v973_v60, %v447_v2 }
 0x182   : > { %v449_v4 = vadd.f32 -0.28449672, %v448_v3 }
 0x184   : > { %v450_v5 = vmul.f32 %v973_v60, %v449_v4 }
 0x186   : > { %v451_v6 = vadd.f32 0.2548296, %v450_v5 }
 0x188   : > { %v452_v7 = vmul.f32 %v973_v60, %v451_v6 }
 0x18a   : > { %v457_v9 = vmul.f32 %v975_v8, %v452_v7 }
 0x18c   : > { %v458_v10 = vsub.f32 1.0, %v457_v9 }
 0x18e   : > { %v460_v11 = vsub.f32 0.0, %v458_v10 }
 0x190   : > { %v461_v12 = vsel %vm459_vm1, %v460_v11, %v458_v10 }
 0x191   : > { %v462_v14 = vadd.f32 1.0, %v461_v12 }
 0x193   : > { %v463_v15 = vmul.f32 %v462_v14, %v437_v13 }
 0x195   : > { %834 = vmatmul.mubr.f32.vlgmr.msra.gmra.mrb[0].mxu1 %v463_v15 }
 0x268   : > { %v546_v16 = vpop.f32.mrb[0].mxu1 }
 0x269   : > { %v835_v18 = vpop.f32.mrb[1].mxu1  ;;  %v563_v19 = vadd.f32 %v727_v17, %v546_v16 }
 0x26b   : > { %564 = vst [vmem:[%s329_s9] sm:$0xff] %v563_v19 }
 0x26c   : > { %1075 = shalt.err (!%p1072_p11)
}
 0x26d   : > { %s1076_s13 = scalar_lea.hbm %s1419_s14, 128  ;;  %s1080_s30 = scalar_lea.hbm %s1473_s5, 256 }
 0x26e   : > { %p1077_p0 = scmp.ne.s32.totalorder %s1419_s14, %s1076_s13  ;;  %p1081_p6 = scmp.lt.u32.totalorder %s1419_s14, %s1473_s5 }
 0x26f   : > { %p1082_p7 = scmp.lt.u32.totalorder %s1080_s30, %s1076_s13  ;;  %p1084_p8 = scmp.lt.u32.totalorder %s1076_s13, %s1419_s14 }
 0x270   : > { %p1078_p4 = pnand %p1077_p0, %p1488_p12 }
 0x271   : > { %p1083_p2 = por %p1082_p7, %p1081_p6 }
 0x272   : > { %p1079_p13 = pneg %p1078_p4 }
 0x273   : > { %p1085_p1 = por %p1084_p8, %p1083_p2 }
 0x275   : > { %p1086_p10 = pnand %p1085_p1, %p1079_p13 }
 0x277   : > { %1089 = shalt.err (!%p1086_p10)
}
 0x278   : > { %894 = dma.vmem_to_hbm [thread:$0]  (%p1488_p12), %s1421_s11, 128, %s1419_s14, %s566_s10  }
 0x279 PF: > { %s592_s9 = sand.u32 1, %s1128_s18   ;;  %p1489_p3 = scmp.ne.s32.totalorder %s1481_s29, 0 }
 0x27a   : > { %p1490_p5 = scmp.ge.s32.totalorder %s1148_s23, 2  ;;  %s593_s15 = scalar_lea.sflag [#allocation4], %s592_s9 }
 0x27c   : > { %p908_p9 = pnand %p1490_p5, %p1489_p3 }
 0x27e   : > { %1123 = dma.done.wait (!%p908_p9), %s593_s15, 128  }
 0x27f   : > { %1125 = vsyncadd (!%p908_p9), %s593_s15, 4294967168  ;;  %s22_s23 = sadd.s32 1, %s1148_s23   ;;  %s1491_s18 = smov %s1132_s19 }
 0x280   : > { %p19_p11 = scmp.ge.s32.totalorder %s22_s23, 4   ;;  %s1492_s19 = smov %s1136_s20 }
 0x281   : > { %s1493_s20 = smov %s1331_s6  ;;  %s1494_s21 = smov %s1144_s22 }
 0x282   : > { %s1495_s22 = smov %s1497_s12  ;;  %21 = sbr.rel (!%p19_p11) target bundleno = 7 (0x7), region = 109 }
 0x289   :  { %598 = vsyncpa [#allocation3], 1 }
 0x28a   :  { %600 = vsyncpa [#allocation3 + $0x1], 1 }
 0x28b   :  { %601 = vsyncpa [#allocation6], 1 }
 0x28c   :  { %602 = vsyncpa [#allocation4], 1 }
 0x28d   :  { %604 = vsyncpa [#allocation4 + $0x1], 1 }

</bundles_post_ra>
